<compile_context>
chip_gen: v6e
topology: v6e:2x2x1
jax: 0.10.0
libtpu: 0.0.40
codegen_flags: <defaults>
</compile_context>

<pallas_src>
import functools

import jax
import jax.numpy as jnp
from jax.experimental import pallas as pl
from jax.experimental.pallas import tpu as pltpu


def _per_input_block_target_bytes():
    """Real bytes per input stream per grid step: ~2 MiB (v5e/v6e), ~4 MiB on
    v7x where per-TC HBM bandwidth is higher so fixed step overhead is a
    larger fraction of each step."""
    target = 2 * 1024 * 1024
    try:  # best-effort generation query; any failure -> conservative default
        info = pltpu.get_tpu_info()
        if "7" in str(getattr(info, "chip_version", "")):
            target = 4 * 1024 * 1024
    except Exception:
        pass
    return target


def _choose_layout(H, W):
    """(rows, cols) for a free (B, C, rows, cols) view of (B, C, H, W) with
    rows * cols == H * W, cols lane-dense (multiple of 128) when possible and
    rows divisible by 8 when possible.  Blocks tile only the rows axis, so any
    such view keeps every DMA fully contiguous."""
    HW = H * W
    if W % 128 == 0 and H % 8 == 0:
        return H, W                       # native NCHW view, fully dense
    cands = [128, 256, 512, 1024, 2048, 4096]
    if W % 128 == 0 and W not in cands:
        cands.insert(0, W)
    for L in cands:                       # prefer a view with rows % 8 == 0
        if HW % L == 0 and (HW // L) % 8 == 0:
            return HW // L, L
    for L in cands:
        if HW % L == 0:
            return HW // L, L
    return H, W                           # fallback: native (lanes may underfill)


def _choose_row_tile(R, row_bytes, target_bytes):
    """Rows per block.  Prefers an even multiple-of-8 divisor of R (no ragged
    tail, no wasted DMA); otherwise near-even multiple-of-8 tiles with the
    last (ragged) tile masked in-kernel.  Returns (r_tile, ragged)."""
    if R * row_bytes <= target_bytes or R <= 8:
        return R, False                   # full rows dim: always a legal block
    max_rows = min(max(int(target_bytes // row_bytes), 8), R)
    hi = (max_rows // 8) * 8
    lo = max((hi // 2 // 8) * 8, 8)
    d = hi
    while d >= lo:                        # even multiple-of-8 divisor of R
        if R % d == 0:
            return d, False
        d -= 8
    n_tiles = pl.cdiv(R, max_rows)        # ragged fallback: near-even tiles
    r_tile = ((pl.cdiv(R, n_tiles) + 7) // 8) * 8
    r_tile = max(min(r_tile, hi), 8)
    return r_tile, (R % r_tile) != 0


def _masked_l2_kernel(img_ref, prd_ref, msk_ref, out_ref, acc_ref, *,
                      weight_known, weight_delta, rows, ragged):
    o = pl.program_id(1)
    i = pl.program_id(2)
    n_inner = pl.num_programs(2)
    first = i == 0
    last_inner = i == n_inner - 1

    C = img_ref.shape[1]                  # static block shape
    CM = msk_ref.shape[1]                 # 1 or C
    r_tile = img_ref.shape[2]

    diff = prd_ref[...].astype(jnp.float32) - img_ref[...].astype(jnp.float32)
    sq = diff * diff                                       # (1, C, r, c)
    m = msk_ref[...].astype(jnp.float32)                   # (1, CM, r, c)
    # pixel_weights = m*wm + (1-m)*wk  ==  wk + m*(wm - wk)   (folded)
    w = jnp.float32(weight_known) + m * jnp.float32(weight_delta)

    # Channel reduce = unrolled adds over the leading axis (pure VPU work).
    if CM == 1:
        s = sq[:, 0:1]
        for c in range(1, C):
            s = s + sq[:, c:c + 1]
        csum = w * s                                       # (1, 1, r, c)
    else:
        p = w * sq
        csum = p[:, 0:1]
        for c in range(1, C):
            csum = csum + p[:, c:c + 1]

    if not ragged:
        @pl.when(first)
        def _():
            acc_ref[...] = csum                            # skip zero-init RMW

        @pl.when(jnp.logical_not(first))
        def _():
            acc_ref[...] += csum
    else:
        t_global = o * n_inner + i
        n_total = pl.num_programs(1) * n_inner
        is_last_tile = t_global == n_total - 1

        @pl.when(first)
        def _():
            acc_ref[...] = jnp.zeros_like(acc_ref)

        @pl.when(jnp.logical_not(is_last_tile))
        def _():
            acc_ref[...] += csum

        @pl.when(is_last_tile)
        def _():
            # Only the globally-last tile can read past `rows`; select the
            # out-of-bounds rows out (select, not multiply, so OOB NaN/Inf
            # garbage cannot propagate).
            r = jax.lax.broadcasted_iota(jnp.int32, csum.shape, 2)
            good = (t_global * r_tile + r) < rows
            acc_ref[...] += jnp.where(good, csum, jnp.float32(0.0))

    @pl.when(last_inner)
    def _():
        # One cross-lane/sublane reduce per (batch, outer) group.
        out_ref[...] = jnp.sum(acc_ref[...], keepdims=True)


def masked_l2_loss(image, predicted_image, mask, *,
                   weight_known, weight_missing):
    """Pallas-TPU forward of LaMa MaskedL2Loss.

    Returns {'loss': {'masked_l2_loss': scalar_f32}, 'values_to_log': {}}.
    """
    image = jnp.asarray(image)
    predicted_image = jnp.asarray(predicted_image)
    assert image.shape == predicted_image.shape
    assert image.ndim == 4, "expected NCHW inputs"
    B, C, H, W = image.shape
    n_true = B * C * H * W                # mean over the broadcasted shape

    # Mask: keep it narrow in HBM (bool -> bf16); upcast to f32 in-kernel.
    mask = jnp.asarray(mask)
    if mask.dtype == jnp.bool_:
        mask = mask.astype(jnp.bfloat16)
    elif not jnp.issubdtype(mask.dtype, jnp.floating):
        mask = mask.astype(jnp.float32)

    # Canonicalise mask to (Bm, CM, H, W) with Bm in {1, B}, CM in {1, C};
    # the batch/channel broadcasts happen via the index_map, not in HBM.
    if mask.ndim == 2:                                     # (H, W)
        mask = mask[None, None]
    elif mask.ndim == 3:                                   # (B|1, H, W)
        mask = mask[:, None]
    if (mask.ndim != 4 or mask.shape[2:] != (H, W)
            or mask.shape[0] not in (1, B) or mask.shape[1] not in (1, C)):
        mask = jnp.broadcast_to(mask, image.shape)         # rare: materialise
    Bm, CM = mask.shape[0], mask.shape[1]

    # Lane-dense spatial view (free, contiguous reshape).
    R, cols = _choose_layout(H, W)
    img4 = image.reshape(B, C, R, cols)
    prd4 = predicted_image.reshape(B, C, R, cols)
    msk4 = mask.reshape(Bm, CM, R, cols)

    data_itemsize = jnp.dtype(image.dtype).itemsize
    target = _per_input_block_target_bytes()
    r_tile, ragged = _choose_row_tile(R, C * cols * data_itemsize, target)

    n_t = pl.cdiv(R, r_tile)
    # Extra parallel spatial split so both v7x TensorCores stay busy even for
    # B == 1 (harmless on single-TC chips: just a loop split).
    n_outer = 2 if (n_t % 2 == 0 and n_t >= 2) else 1
    n_inner = n_t // n_outer

    def data_idx(b, o, i):
        return (b, 0, o * n_inner + i, 0)

    if Bm == B:
        mask_idx = lambda b, o, i: (b, 0, o * n_inner + i, 0)
    else:
        mask_idx = lambda b, o, i: (0, 0, o * n_inner + i, 0)

    # Explicit scoped-VMEM budget: 2 data streams + 1 mask stream, double
    # buffered, plus the f32 block accumulator (padded (8,128) estimate).
    pr = ((r_tile + 7) // 8) * 8
    pc = ((cols + 127) // 128) * 128
    blk_data = C * pr * pc * data_itemsize
    blk_mask = CM * pr * pc * jnp.dtype(msk4.dtype).itemsize
    needed = 2 * (2 * blk_data + blk_mask) + pr * pc * 4
    vmem_limit = int(min(64 * 1024 * 1024,
                         max(needed + (8 << 20), 32 * 1024 * 1024)))

    # Weights / shapes are baked in as compile-time constants (fixed
    # hyperparameters); changing them triggers a recompile.
    kernel = functools.partial(
        _masked_l2_kernel,
        weight_known=float(weight_known),
        weight_delta=float(weight_missing) - float(weight_known),
        rows=int(R),
        ragged=bool(ragged),
    )

    partials = pl.pallas_call(
        kernel,
        out_shape=jax.ShapeDtypeStruct((B, n_outer, 1, 1), jnp.float32),
        grid_spec=pltpu.PrefetchScalarGridSpec(
            num_scalar_prefetch=0,
            grid=(B, n_outer, n_inner),
            in_specs=[pl.BlockSpec((1, C, r_tile, cols), data_idx),
                      pl.BlockSpec((1, C, r_tile, cols), data_idx),
                      pl.BlockSpec((1, CM, r_tile, cols), mask_idx)],
            out_specs=pl.BlockSpec((1, 1, 1, 1), lambda b, o, i: (b, o, 0, 0)),
            scratch_shapes=[pltpu.VMEM((1, 1, r_tile, cols), jnp.float32)],
        ),
        compiler_params=pltpu.CompilerParams(
            dimension_semantics=("parallel", "parallel", "arbitrary"),
            vmem_limit_bytes=vmem_limit),
    )(img4, prd4, msk4)

    loss = jnp.sum(partials) / jnp.float32(n_true)
    return {'loss': {'masked_l2_loss': loss}, 'values_to_log': dict()}


if __name__ == "__main__":
    key = jax.random.PRNGKey(0)
    k1, k2, k3 = jax.random.split(key, 3)

    B, C, H, W = 2, 4, 16, 16             # NCHW, as in the PyTorch module
    image = jax.random.normal(k1, (B, C, H, W), dtype=jnp.float32)
    predicted_image = jax.random.normal(k2, (B, C, H, W), dtype=jnp.float32)
    # Binary mask (B, 1, H, W); broadcast over channels inside the kernel.
    mask = (jax.random.uniform(k3, (B, 1, H, W)) > 0.5).astype(jnp.float32)

    weight_known, weight_missing = 10.0, 100.0

    out = masked_l2_loss(image, predicted_image, mask,
                         weight_known=weight_known,
                         weight_missing=weight_missing)
    loss = jax.block_until_ready(out['loss']['masked_l2_loss'])

    # Pure-JAX reference check.
    mask_b = jnp.broadcast_to(mask, image.shape)
    per_pixel_l2 = (predicted_image - image) ** 2
    pixel_weights = mask_b * weight_missing + (1 - mask_b) * weight_known
    ref = jnp.mean(pixel_weights * per_pixel_l2)
    assert jnp.allclose(loss, ref, rtol=1e-5, atol=1e-5), (loss, ref)

    print("KERNEL_OK")
</pallas_src>

<mosaic_0001>
module attributes {stable_mosaic.version = 11 : i64} {
  func.func @_masked_l2_kernel(%arg0: i32, %arg1: i32, %arg2: i32, %arg3: memref<1x4x2x128xf32, #tpu.memory_space<vmem>>, %arg4: memref<1x4x2x128xf32, #tpu.memory_space<vmem>>, %arg5: memref<1x1x2x128xf32, #tpu.memory_space<vmem>>, %arg6: memref<1x1x1x1xf32, #tpu.memory_space<vmem>>, %arg7: memref<1x1x2x128xf32, #tpu.memory_space<vmem>>) attributes {dimension_semantics = [#tpu.dimension_semantics<parallel>, #tpu.dimension_semantics<parallel>, #tpu.dimension_semantics<arbitrary>], iteration_bounds = array<i64: 2, 1, 1>, scalar_prefetch = 0 : i64, scratch_operands = 1 : i64, tpu.core_type = #tpu.core_type<tc>, window_params = [{transform_indices = @transform_0, window_bounds = array<i64: 1, 4, 2, 128>}, {transform_indices = @transform_1, window_bounds = array<i64: 1, 4, 2, 128>}, {transform_indices = @transform_2, window_bounds = array<i64: 1, 1, 2, 128>}, {transform_indices = @transform_3, window_bounds = array<i64: 1, 1, 1, 1>}]} {
    %c0_i32 = arith.constant 0 : i32
    %0 = arith.cmpi eq, %arg2, %c0_i32 : i32
    %c0_i32_0 = arith.constant 0 : i32
    %1 = arith.cmpi eq, %arg2, %c0_i32_0 : i32
    %c0 = arith.constant 0 : index
    %c0_1 = arith.constant 0 : index
    %c0_2 = arith.constant 0 : index
    %c0_3 = arith.constant 0 : index
    %2 = vector.load %arg4[%c0, %c0_1, %c0_2, %c0_3] : memref<1x4x2x128xf32, #tpu.memory_space<vmem>>, vector<1x4x2x128xf32>
    %c0_4 = arith.constant 0 : index
    %c0_5 = arith.constant 0 : index
    %c0_6 = arith.constant 0 : index
    %c0_7 = arith.constant 0 : index
    %3 = vector.load %arg3[%c0_4, %c0_5, %c0_6, %c0_7] : memref<1x4x2x128xf32, #tpu.memory_space<vmem>>, vector<1x4x2x128xf32>
    %4 = arith.subf %2, %3 : vector<1x4x2x128xf32>
    %5 = arith.mulf %4, %4 : vector<1x4x2x128xf32>
    %c0_8 = arith.constant 0 : index
    %c0_9 = arith.constant 0 : index
    %c0_10 = arith.constant 0 : index
    %c0_11 = arith.constant 0 : index
    %6 = vector.load %arg5[%c0_8, %c0_9, %c0_10, %c0_11] : memref<1x1x2x128xf32, #tpu.memory_space<vmem>>, vector<1x1x2x128xf32>
    %cst = arith.constant 9.000000e+01 : f32
    %7 = vector.broadcast %cst : f32 to vector<1x1x2x128xf32>
    %8 = arith.mulf %6, %7 : vector<1x1x2x128xf32>
    %cst_12 = arith.constant 1.000000e+01 : f32
    %9 = vector.broadcast %cst_12 : f32 to vector<1x1x2x128xf32>
    %10 = arith.addf %9, %8 : vector<1x1x2x128xf32>
    %11 = vector.extract_strided_slice %5 {offsets = [0, 0, 0, 0], sizes = [1, 1, 2, 128], strides = [1, 1, 1, 1]} : vector<1x4x2x128xf32> to vector<1x1x2x128xf32>
    %12 = vector.extract_strided_slice %5 {offsets = [0, 1, 0, 0], sizes = [1, 1, 2, 128], strides = [1, 1, 1, 1]} : vector<1x4x2x128xf32> to vector<1x1x2x128xf32>
    %13 = arith.addf %11, %12 : vector<1x1x2x128xf32>
    %14 = vector.extract_strided_slice %5 {offsets = [0, 2, 0, 0], sizes = [1, 1, 2, 128], strides = [1, 1, 1, 1]} : vector<1x4x2x128xf32> to vector<1x1x2x128xf32>
    %15 = arith.addf %13, %14 : vector<1x1x2x128xf32>
    %16 = vector.extract_strided_slice %5 {offsets = [0, 3, 0, 0], sizes = [1, 1, 2, 128], strides = [1, 1, 1, 1]} : vector<1x4x2x128xf32> to vector<1x1x2x128xf32>
    %17 = arith.addf %15, %16 : vector<1x1x2x128xf32>
    %18 = arith.mulf %10, %17 : vector<1x1x2x128xf32>
    %19 = arith.extui %0 : i1 to i32
    %c0_i32_13 = arith.constant 0 : i32
    %20 = arith.cmpi ne, %19, %c0_i32_13 : i32
    scf.if %20 {
      %c0_16 = arith.constant 0 : index
      %c0_17 = arith.constant 0 : index
      %c0_18 = arith.constant 0 : index
      %c0_19 = arith.constant 0 : index
      %26 = vector.load %arg7[%c0_16, %c0_17, %c0_18, %c0_19] : memref<1x1x2x128xf32, #tpu.memory_space<vmem>>, vector<1x1x2x128xf32>
      tpu.vector_store %arg7[%c0_16, %c0_17, %c0_18, %c0_19], %18 {strides = array<i32>} : memref<1x1x2x128xf32, #tpu.memory_space<vmem>>, vector<1x1x2x128xf32>,
    } else {
    }
    %true = arith.constant true
    %21 = arith.xori %0, %true : i1
    %22 = arith.extui %21 : i1 to i32
    %c0_i32_14 = arith.constant 0 : i32
    %23 = arith.cmpi ne, %22, %c0_i32_14 : i32
    scf.if %23 {
      %c0_16 = arith.constant 0 : index
      %c0_17 = arith.constant 0 : index
      %c0_18 = arith.constant 0 : index
      %c0_19 = arith.constant 0 : index
      %26 = vector.load %arg7[%c0_16, %c0_17, %c0_18, %c0_19] : memref<1x1x2x128xf32, #tpu.memory_space<vmem>>, vector<1x1x2x128xf32>
      %27 = arith.addf %26, %18 : vector<1x1x2x128xf32>
      %c0_20 = arith.constant 0 : index
      %c0_21 = arith.constant 0 : index
      %c0_22 = arith.constant 0 : index
      %c0_23 = arith.constant 0 : index
      %28 = vector.load %arg7[%c0_20, %c0_21, %c0_22, %c0_23] : memref<1x1x2x128xf32, #tpu.memory_space<vmem>>, vector<1x1x2x128xf32>
      tpu.vector_store %arg7[%c0_20, %c0_21, %c0_22, %c0_23], %27 {strides = array<i32>} : memref<1x1x2x128xf32, #tpu.memory_space<vmem>>, vector<1x1x2x128xf32>,
    } else {
    }
    %24 = arith.extui %1 : i1 to i32
    %c0_i32_15 = arith.constant 0 : i32
    %25 = arith.cmpi ne, %24, %c0_i32_15 : i32
    scf.if %25 {
      %c0_16 = arith.constant 0 : index
      %c0_17 = arith.constant 0 : index
      %c0_18 = arith.constant 0 : index
      %c0_19 = arith.constant 0 : index
      %26 = vector.load %arg7[%c0_16, %c0_17, %c0_18, %c0_19] : memref<1x1x2x128xf32, #tpu.memory_space<vmem>>, vector<1x1x2x128xf32>
      %27 = vector.shape_cast %26 : vector<1x1x2x128xf32> to vector<1x1x1x2x128xf32>
      %cst_20 = arith.constant dense<0.000000e+00> : vector<1xf32>
      %28 = vector.multi_reduction <add>, %27, %cst_20 [1, 2, 3, 4] : vector<1x1x1x2x128xf32> to vector<1xf32>
      %29 = vector.shape_cast %28 : vector<1xf32> to vector<1x1x1x1x1xf32>
      %30 = vector.extract %29[0, 0, 0, 0, 0] : f32 from vector<1x1x1x1x1xf32>
      %31 = vector.broadcast %30 : f32 to vector<1x1x1x1xf32>
      %c0_21 = arith.constant 0 : index
      %c0_22 = arith.constant 0 : index
      %c0_23 = arith.constant 0 : index
      %c0_24 = arith.constant 0 : index
      %32 = vector.load %arg6[%c0_21, %c0_22, %c0_23, %c0_24] : memref<1x1x1x1xf32, #tpu.memory_space<vmem>>, vector<1x1x1x1xf32>
      tpu.vector_store %arg6[%c0_21, %c0_22, %c0_23, %c0_24], %31 {strides = array<i32>} : memref<1x1x1x1xf32, #tpu.memory_space<vmem>>, vector<1x1x1x1xf32>,
    } else {
    }
    return
  }
  func.func @transform_0(%arg0: i32, %arg1: i32, %arg2: i32) -> (i32, i32, i32, i32) {
    %c1_i32 = arith.constant 1 : i32
    %0 = arith.muli %arg1, %c1_i32 : i32
    %1 = arith.addi %0, %arg2 : i32
    %c0_i32 = arith.constant 0 : i32
    %c0_i32_0 = arith.constant 0 : i32
    %c0_i32_1 = arith.constant 0 : i32
    return %arg0, %c0_i32, %1, %c0_i32_0 : i32, i32, i32, i32
  }
  func.func @transform_1(%arg0: i32, %arg1: i32, %arg2: i32) -> (i32, i32, i32, i32) {
    %c1_i32 = arith.constant 1 : i32
    %0 = arith.muli %arg1, %c1_i32 : i32
    %1 = arith.addi %0, %arg2 : i32
    %c0_i32 = arith.constant 0 : i32
    %c0_i32_0 = arith.constant 0 : i32
    %c0_i32_1 = arith.constant 0 : i32
    return %arg0, %c0_i32, %1, %c0_i32_0 : i32, i32, i32, i32
  }
  func.func @transform_2(%arg0: i32, %arg1: i32, %arg2: i32) -> (i32, i32, i32, i32) {
    %c1_i32 = arith.constant 1 : i32
    %0 = arith.muli %arg1, %c1_i32 : i32
    %1 = arith.addi %0, %arg2 : i32
    %c0_i32 = arith.constant 0 : i32
    %c0_i32_0 = arith.constant 0 : i32
    %c0_i32_1 = arith.constant 0 : i32
    return %arg0, %c0_i32, %1, %c0_i32_0 : i32, i32, i32, i32
  }
  func.func @transform_3(%arg0: i32, %arg1: i32, %arg2: i32) -> (i32, i32, i32, i32) {
    %c0_i32 = arith.constant 0 : i32
    %c0_i32_0 = arith.constant 0 : i32
    %c0_i32_1 = arith.constant 0 : i32
    return %arg0, %arg1, %c0_i32, %c0_i32_0 : i32, i32, i32, i32
  }
}

</mosaic_0001>

<bundles_post_ra>
// kernel: tpu_custom_call.1
= control target key start
LH: loop header
LB: loop body
LE: loop exit
PB: predicated region body
PF: predicated region fallthrough
CT: control target
= control target key end

     0   :  { %8 = vsyncpa [#allocation4], 0  ;;  %s891_s0 = inlined_call_operand.hbm [shape: f32[2,4,2,128], index: 0, kind: input, shape index: {}]   ;;  %s892_s1 = inlined_call_operand.hbm [shape: f32[2,4,2,128], index: 1, kind: input, shape index: {}]   ;;  %s893_s2 = inlined_call_operand.hbm [shape: f32[2,1,2,128], index: 2, kind: input, shape index: {}]   ;;  %s894_s3 = inlined_call_operand.vmem [shape: f32[2,1,1,1], index: 3, kind: output, shape index: {}]  }
   0x1   :  { %10 = vsyncpa [#allocation4 + $0x1], 0 }
   0x2   :  { %11 = vsyncpa [#allocation6], 0 }
   0x3   :  { %13 = vsyncpa [#allocation6 + $0x1], 0  ;;  %s747_s12 = smov 0   ;;  %s749_s13 = smov 0  }
   0x4   :  { %s751_s14 = smov 0   ;;  %s753_s15 = smov 0  }
   0x5   :  { %s755_s16 = smov 0   ;;  %s757_s17 = smov 0  }
   0x6 LB: > { %s895_s18 = sadd.s32 4294967295, %s720_s17   ;;  %s38_s19 = sadd.s32 1, %s716_s16  ;;  %s720_s17 = sphi %s757_s17, %s19_s17   ;;  %s716_s16 = sphi %s755_s16, %s904_s16   ;;  %s712_s15 = sphi %s753_s15, %s903_s15   ;;  %s708_s14 = sphi %s751_s14, %s902_s14   ;;  %s704_s13 = sphi %s749_s13, %s901_s13   ;;  %s700_s12 = sphi %s747_s12, %s900_s12  }
   0x7   : > { %p40_p0 = scmp.ge.s32.totalorder %s38_s19, 2  ;;  %s49_s20 = sadd.s32 1, %s708_s14 }
   0x8   : > { %p56_p1 = scmp.ne.s32.totalorder %s708_s14, %s704_s13  ;;  %p57_p2 = scmp.eq.s32.totalorder %s720_s17, 0 }
   0x9   : > { %s906_s19 = smov (%p40_p0, %s38_s19), 0  ;;  %p62_p4 = scmp.ne.s32.totalorder %s704_s13, %s700_s12 }
   0xa   : > { %p58_p3 = por %p57_p2, %p56_p1  ;;  %s44_s21 = ssub.s32 %s716_s16, %s906_s19 }
   0xb   : > { %p63_p5 = scmp.eq.s32.totalorder %s895_s18, 0  ;;  %p47_p6 = scmp.eq.s32.totalorder %s44_s21, 0 }
   0xc   : > { %p531_p8 = scmp.lt.s32.totalorder %s720_s17, 2  ;;  %s797_s24 = sand.u32 1, %s708_s14  }
   0xd   : > { %p788_p7 = por %p63_p5, %p62_p4  ;;  %s511_s25 = sshll.u32 %s716_s16, 7 }
   0xe   : > { %s794_s23 = scalar_select %p47_p6, %s708_s14, %s49_s20  }
   0xf   : > { %s497_s26 = sshll.u32 %s797_s24, 3  ;;  %p801_p9 = pnand %p531_p8, %p58_p3 }
  0x10   : > { %s197_s28 = sand.u32 1, %s720_s17   ;;  %s209_s4 = scalar_lea.hbm %s892_s1, %s511_s25 }
  0x11   : > { %s201_s5 = scalar_lea.vmem [#allocation5], %s497_s26  ;;  %p505_p10 = scmp.ge.s32.totalorder %s720_s17, 1 }
  0x12   : > { %s210_s6 = sshll.u32 %s201_s5, 4  ;;  %s814_s7 = scalar_lea.sflag [#allocation6], %s197_s28  ;;  %s211_s6 = int_to_ptr.vmem [resolvable:$true] %s210_s6 }
  0x13   : > { %p584_p11 = pneg %p801_p9  ;;  %s595_s8 = scalar_lea.vmem %s211_s6, 128 }
  0x14   : > { %p596_p12 = scmp.ne.s32.totalorder %s211_s6, %s595_s8  ;;  %s722_s9 = smov [#allocation5]  }
  0x15   : > { %s600_s10 = sshll.u32 %s722_s9, 4  ;;  %s601_s10 = int_to_ptr.vmem [resolvable:$false] %s600_s10 }
  0x16   : > { %p598_p13 = pnand %p596_p12, %p584_p11  ;;  %s602_s11 = scalar_lea.vmem %s601_s10, 256 }
  0x17   : > { %p603_p1 = scmp.lt.s32.totalorder %s211_s6, %s601_s10  ;;  %p604_p2 = scmp.lt.s32.totalorder %s602_s11, %s595_s8 }
  0x18   : > { %p599_p0 = pneg %p598_p13 }
  0x19   : > { %p605_p3 = por %p604_p2, %p603_p1 }
  0x1b   : > { %p606_p4 = pnand %p605_p3, %p599_p0 }
  0x1d   : > { %609 = shalt.err (!%p606_p4)
}
  0x1e   : > { %s723_s12 = smov 32   ;;  %s724_s20 = smov 2  }
  0x1f   : > { %527 = dma.hbm_to_vmem [thread:$0]  (!%p801_p9), %s209_s4, 128, %s211_s6, %s814_s7, %s723_s12, %s723_s12, %s724_s20  }
  0x20   : > { %p238_p5 = scmp.lt.s32.totalorder %s720_s17, 3  ;;  %s186_s30 = scalar_lea.hbm %s891_s0, %s511_s25 }
  0x21   : > { %s178_s5 = scalar_lea.vmem [#allocation3], %s497_s26  ;;  %s503_s9 = sshll.u32 %s797_s24, 1 }
  0x22   : > { %p827_p6 = pnand %p505_p10, %p238_p5  ;;  %s187_s8 = sshll.u32 %s178_s5, 4  ;;  %s188_s8 = int_to_ptr.vmem [resolvable:$true] %s187_s8 }
  0x23   : > { %s175_s10 = scalar_lea.sflag [#allocation4], %s797_s24  ;;  %s623_s11 = scalar_lea.vmem %s188_s8, 128 }
  0x24   : > { %p624_p8 = scmp.ne.s32.totalorder %s188_s8, %s623_s11  ;;  %s725_s4 = smov [#allocation3]  }
  0x25   : > { %s628_s6 = sshll.u32 %s725_s4, 4  ;;  %s629_s6 = int_to_ptr.vmem [resolvable:$false] %s628_s6 }
  0x26   : > { %p626_p12 = pnand %p624_p8, %p584_p11  ;;  %s630_s18 = scalar_lea.vmem %s629_s6, 256 }
  0x27   : > { %p631_p13 = scmp.lt.s32.totalorder %s188_s8, %s629_s6  ;;  %p632_p0 = scmp.lt.s32.totalorder %s630_s18, %s623_s11 }
  0x28   : > { %p627_p10 = pneg %p626_p12 }
  0x29   : > { %p633_p1 = por %p632_p0, %p631_p13 }
  0x2b   : > { %p634_p2 = pnand %p633_p1, %p627_p10 }
  0x2d   : > { %637 = shalt.err (!%p634_p2)
}
  0x2e   : > { %524 = dma.hbm_to_vmem [thread:$0]  (!%p801_p9), %s186_s30, 128, %s188_s8, %s175_s10, %s723_s12, %s723_s12, %s724_s20  }
  0x2f   : > { %s504_s24 = sshll.u32 %s716_s16, 5  ;;  %s224_s29 = scalar_lea.vmem [#allocation7], %s503_s9 }
  0x30   : > { %s231_s28 = scalar_lea.hbm %s893_s2, %s504_s24  ;;  %s233_s5 = sshll.u32 %s224_s29, 4  ;;  %s234_s5 = int_to_ptr.vmem [resolvable:$true] %s233_s5 }
  0x31   : > { %s651_s4 = scalar_lea.vmem %s234_s5, 32  ;;  %s726_s18 = smov [#allocation7]  }
  0x32   : > { %p652_p3 = scmp.ne.s32.totalorder %s234_s5, %s651_s4  ;;  %s656_s11 = sshll.u32 %s726_s18, 4  ;;  %s657_s11 = int_to_ptr.vmem [resolvable:$false] %s656_s11 }
  0x33   : > { %s658_s6 = scalar_lea.vmem %s657_s11, 64  ;;  %p659_p8 = scmp.lt.s32.totalorder %s234_s5, %s657_s11 }
  0x34   : > { %p654_p4 = pnand %p652_p3, %p584_p11  ;;  %p660_p12 = scmp.lt.s32.totalorder %s658_s6, %s651_s4 }
  0x36   : > { %p655_p5 = pneg %p654_p4  ;;  %p661_p10 = por %p660_p12, %p659_p8 }
  0x38   : > { %p662_p13 = pnand %p661_p10, %p655_p5 }
  0x3a   : > { %665 = shalt.err (!%p662_p13)
}
  0x3b   : > { %530 = dma.hbm_to_vmem [thread:$0]  (!%p801_p9), %s231_s28, 32, %s234_s5, %s814_s7  }
  0x3c   : > { %242 = sbr.rel (%p827_p6) target bundleno = 296 (0x128), region = 32  ;;  %s244_s12 = sand.u32 (!%p827_p6), 1, %s704_s13  }
  0x3d   : > { %s506_s20 = sshll.u32 (!%p827_p6), %s244_s12, 3  ;;  %s245_s30 = scalar_lea.sflag (!%p827_p6), [#allocation4], %s244_s12 }
  0x3e   : > { %s248_s8 = scalar_lea.vmem (!%p827_p6), [#allocation3], %s506_s20 }
  0x41   : > { %691 = dma.done.wait (%p788_p7), %s245_s30, 128  }
  0x42   : > { %693 = vsyncadd (%p788_p7), %s245_s30, 4294967168  ;;  %s899_s9 = sadd.s32 4294967295, %s720_s17   ;;  %s257_s7 = scalar_lea.vmem [#allocation5], %s506_s20 }
  0x43   : > { %s253_s27 = sand.u32 1, %s899_s9  }
  0x44   : > { %s254_s10 = scalar_lea.sflag [#allocation6], %s253_s27 }
  0x45   : > { %695 = dma.done.wait (%p788_p7), %s254_s10, 160  }
  0x46   : > { %697 = vsyncadd (%p788_p7), %s254_s10, 4294967136  ;;  %s508_s21 = sshll.u32 %s244_s12, 1  ;;  %v310_v0 = vld [vmem:[%s257_s7] sm:$0x3]  ;;  %v311_v1 = vld [vmem:[%s257_s7 + $0x2] sm:$0x3] }
  0x47   : > { %v312_v2 = vld [vmem:[%s257_s7 + $0x4] sm:$0x3]  ;;  %v313_v3 = vld [vmem:[%s257_s7 + $0x6] sm:$0x3]  ;;  %v314_v4 = vld [vmem:[%s248_s8] sm:$0x3] }
  0x48   : > { %v315_v5 = vld [vmem:[%s248_s8 + $0x2] sm:$0x3]  ;;  %v316_v6 = vld [vmem:[%s248_s8 + $0x4] sm:$0x3]  ;;  %v317_v7 = vld [vmem:[%s248_s8 + $0x6] sm:$0x3]  ;;  %v318_v8 = vsub.f32 %v310_v0, %v314_v4 }
  0x49   : > { %v319_v9 = vsub.f32 %v311_v1, %v315_v5  ;;  %s266_s24 = scalar_lea.vmem [#allocation7], %s508_s21  ;;  %v320_v11 = vsub.f32 %v312_v2, %v316_v6  ;;  %v321_v12 = vsub.f32 %v313_v3, %v317_v7  ;;  %vm348_vm0 = vcmask 1041408   ;;  %p303_p7 = scmp.lt.s32.totalorder %s712_s15, 1 }
  0x4a   : > { %v326_v10 = vld [vmem:[%s266_s24] sm:$0x3]  ;;  %v322_v13 = vmul.f32 %v318_v8, %v318_v8  ;;  %vm360_vm1 = vcmask 0  }
  0x4b   : > { %v323_v14 = vmul.f32 %v319_v9, %v319_v9  ;;  %v327_v15 = vmul.f32 90.0, %v326_v10  ;;  %v324_v16 = vmul.f32 %v320_v11, %v320_v11  ;;  %v325_v17 = vmul.f32 %v321_v12, %v321_v12  ;;  %s908_s15 = smov (!%p303_p7, %s712_s15), 1 }
  0x4c   : > { %s308_s26 = scalar_lea.vmem %s894_s3, %s908_s15 }
  0x4d   : > { %v329_v18 = vadd.f32 %v323_v14, %v322_v13  ;;  %v328_v19 = vadd.f32 10.0, %v327_v15 }
  0x4f   : > { %v330_v20 = vadd.f32 %v329_v18, %v324_v16 }
  0x51   : > { %v331_v21 = vadd.f32 %v330_v20, %v325_v17 }
  0x53   : > { %v332_v22 = vmul.f32 %v331_v21, %v328_v19 }
  0x55   : > { %336 = vst [vmem:[#allocation2] sm:$0x3] %v332_v22 }
  0x5c   : > { %v347_v23 = vld [vmem:[#allocation2] sm:$0x3] }
  0x5d   : > { %v349_v24 = vsel %vm348_vm0, %v347_v23, 0.0 }
  0x5e   : > { %350 = vadd.xlane.f32.xlu0 %v349_v24 }
  0xe7   : > { %v351_v25 = vpop.xlane.xlu0 %350 }
  0xe8   : > { %v352_v26 = vrot.slane %v351_v25, 4 }
  0xea   : > { %v353_v27 = vadd.f32 %v352_v26, %v351_v25 }
  0xec   : > { %v354_v28 = vrot.slane %v353_v27, 2 }
  0xee   : > { %v355_v29 = vadd.f32 %v354_v28, %v353_v27 }
  0xf0   : > { %v356_v30 = vrot.slane %v355_v29, 1 }
  0xf2   : > { %v357_v31 = vadd.f32 %v356_v30, %v355_v29 }
  0xf4   : > { %513 = vpush %v357_v31 }
 0x125   : > { %s514_s28 = spop %513 }
 0x126   : > { %v359_v32 = vstv %s514_s28 }
 0x127   : > { %361 = vst.msk [vmem:[%s308_s26] sm:$0x1] %vm360_vm1, %v359_v32 }
 0x128 PF: > { %s19_s17 = sadd.s32 1, %s720_s17   ;;  %s900_s12 = smov %s704_s13 }
 0x129   : > { %p16_p9 = scmp.ge.s32.totalorder %s19_s17, 4   ;;  %s901_s13 = smov %s708_s14 }
 0x12a   : > { %s902_s14 = smov %s794_s23  ;;  %s903_s15 = smov %s716_s16 }
 0x12b   : > { %s904_s16 = smov %s906_s19  ;;  %18 = sbr.rel (!%p16_p9) target bundleno = 6 (0x6), region = 108 }
 0x130   :  { %385 = vsyncpa [#allocation4], 1 }
 0x131   :  { %387 = vsyncpa [#allocation4 + $0x1], 1 }
 0x132   :  { %388 = vsyncpa [#allocation6], 1 }
 0x133   :  { %390 = vsyncpa [#allocation6 + $0x1], 1 }

</bundles_post_ra>
